<compile_context>
chip_gen: v5e
topology: v5e:2x2
jax: 0.10.0
libtpu: 0.0.40
codegen_flags: <defaults>
</compile_context>

<pallas_src>
import functools
import math

import jax
import jax.numpy as jnp
from jax.experimental import pallas as pl
from jax.experimental.pallas import tpu as pltpu


_LANE = 128
_MAX_COLS = 4096                     # widest lane-dense column width we try
_MIN_BLOCK_BYTES = 2 * 1024 * 1024   # never shrink blocks below ~2 MiB


def _softclip_kernel(x_ref, o_ref, *, inv_bound, compute_dtype):
    x = x_ref[...].astype(compute_dtype)
    # y = x / (1 + |x / bound|); divide-by-bound folded into a compile-time
    # reciprocal multiply.
    y = x / (1.0 + jnp.abs(x * inv_bound))
    o_ref[...] = y.astype(o_ref.dtype)


def _ceil_div(a: int, b: int) -> int:
    return -(-a // b)


def _sublane_multiple(dtype) -> int:
    # Min tile is (8,128) for 32-bit, (16,128) for 16-bit, (32,128) for 8-bit.
    return max(8, 32 // jnp.dtype(dtype).itemsize)


@functools.lru_cache(maxsize=1)
def _chip_config():
    """Per-generation tuning: (vmem_limit_bytes, target_block_bytes, n_tc, native_bf16)."""
    kind = ""
    try:
        kind = jax.devices()[0].device_kind.lower()
    except Exception:
        pass
    vmem_cap = None
    try:
        vmem_cap = int(getattr(pltpu.get_tpu_info(), "vmem_capacity_bytes"))
    except Exception:
        vmem_cap = None

    is_v7x = ("7" in kind) or (vmem_cap is not None and vmem_cap <= 64 * 1024 * 1024)
    big_vmem = any(t in kind for t in ("v4", "v5", "v6")) or (
        vmem_cap is not None and vmem_cap >= 128 * 1024 * 1024)

    if is_v7x:
        # v7x: 2 TensorCores, 64 MiB VMEM per core, ~3.2 TB/s HBM.
        vmem_limit, target, n_tc = 48 * 1024 * 1024, 6 * 1024 * 1024, 2
    elif big_vmem:
        # v4/v5e/v5p/v6e: single TensorCore, 128 MiB physical VMEM.
        vmem_limit, target, n_tc = 64 * 1024 * 1024, 8 * 1024 * 1024, 1
    else:
        # Unknown chip: conservative defaults.
        vmem_limit, target, n_tc = 32 * 1024 * 1024, 4 * 1024 * 1024, 1

    if vmem_cap is not None:
        vmem_limit = min(vmem_limit, (vmem_cap * 3) // 4)
        target = min(target, max(1 * 1024 * 1024, vmem_limit // 6))

    # Native bf16 VPU only on v6e/v7x; v5e and older widen once to f32.
    native_bf16 = is_v7x or ("v6" in kind)
    return vmem_limit, target, n_tc, native_bf16


def _pick_cols(total: int, min_rows: int = 64):
    """Largest multiple-of-128 column width dividing `total`, preferring widths
    that still leave >= min_rows rows.  None iff total is not a multiple of 128."""
    widest = None
    for k in range(_MAX_COLS // _LANE, 0, -1):
        c = k * _LANE
        if total % c:
            continue
        if widest is None:
            widest = c
        if total // c >= min_rows:
            return c
    return widest


def _run_2d(x2, *, inv_bound, compute_dtype, vmem_limit_bytes,
            target_block_bytes, num_tc):
    """Run the SoftClip kernel over a lane-dense (rows, cols) slab."""
    rows, cols = x2.shape
    dtype = x2.dtype
    sub = _sublane_multiple(dtype)
    # Size blocks by the wider of (HBM tile, in-kernel compute) footprint so
    # f32-widened bf16 tiles on v5e still fit comfortably.
    sizing_itemsize = max(jnp.dtype(dtype).itemsize, jnp.dtype(compute_dtype).itemsize)
    row_bytes = cols * sizing_itemsize
    total_bytes = rows * row_bytes

    # Fewest grid steps that keep each block <= target size.  On v7x (2 TCs),
    # round the step count up to a multiple of the core count so both cores
    # stream (nearly) equal bytes -- but never shrink blocks below ~2 MiB.
    n_steps = max(1, _ceil_div(total_bytes, target_block_bytes))
    if num_tc > 1 and total_bytes >= num_tc * _MIN_BLOCK_BYTES:
        n_steps = max(n_steps, num_tc)
        n_steps = _ceil_div(n_steps, num_tc) * num_tc

    if n_steps <= 1:
        tile_rows = rows  # single full-array block (always a legal tiling)
    else:
        tile_rows = _ceil_div(_ceil_div(rows, n_steps), sub) * sub
        tile_rows = min(rows, max(sub, tile_rows))
    grid = (_ceil_div(rows, tile_rows),)  # last block may be partial: writes masked

    kernel = functools.partial(_softclip_kernel, inv_bound=inv_bound,
                               compute_dtype=compute_dtype)
    return pl.pallas_call(
        kernel,
        out_shape=jax.ShapeDtypeStruct((rows, cols), dtype),
        grid_spec=pltpu.PrefetchScalarGridSpec(
            num_scalar_prefetch=0,
            grid=grid,
            in_specs=[pl.BlockSpec((tile_rows, cols), lambda i: (i, 0))],
            out_specs=pl.BlockSpec((tile_rows, cols), lambda i: (i, 0)),
        ),
        # Default depth-2 double-buffering already hides DMA for a 1-D
        # streaming grid; spend VMEM on larger blocks instead of deeper buffers.
        compiler_params=pltpu.CompilerParams(
            dimension_semantics=("parallel",),
            vmem_limit_bytes=vmem_limit_bytes,
        ),
    )(x2)


@functools.partial(jax.jit, static_argnames=("bound",))
def soft_clip(x: jax.Array, bound: float = 1.0) -> jax.Array:
    """SoftClip: x / (1 + |x / bound|), computed in a Pallas TPU kernel."""
    if bound == 0:
        raise ValueError("SoftClip bound must be nonzero.")

    orig_shape = x.shape
    orig_dtype = x.dtype
    total = math.prod(orig_shape)
    if total == 0:
        return x

    vmem_limit, target_block, num_tc, native_bf16 = _chip_config()
    compute_dtype = (jnp.bfloat16 if (orig_dtype == jnp.bfloat16 and native_bf16)
                     else jnp.float32)
    inv_bound = float(1.0 / bound)

    run = functools.partial(
        _run_2d, inv_bound=inv_bound, compute_dtype=compute_dtype,
        vmem_limit_bytes=vmem_limit, target_block_bytes=target_block,
        num_tc=num_tc)

    flat = x.reshape(total)  # contiguous reshape: free, no extra HBM pass
    cols = _pick_cols(total)

    if cols is not None:
        # Common case: the element count has a 128-aligned factor -> lane-dense
        # (rows, cols) slab with zero extra copies.
        out_flat = run(flat.reshape(total // cols, cols)).reshape(total)
    else:
        # Awkward element count (not a multiple of 128).  No whole-array
        # pad/slice round trips: push the 128-aligned bulk through the kernel
        # and finish the <128-element tail in plain JAX.
        bulk = (total // _LANE) * _LANE
        if bulk == 0:
            # Fewer than 128 elements: one tiny full-array block.
            out_flat = run(flat.reshape(1, total)).reshape(total)
        else:
            cols_b = _pick_cols(bulk)
            out_bulk = run(flat[:bulk].reshape(bulk // cols_b, cols_b)).reshape(bulk)
            tail = flat[bulk:]
            out_tail = (tail / (1.0 + jnp.abs(tail * inv_bound))).astype(orig_dtype)
            out_flat = jnp.concatenate([out_bulk, out_tail])

    return out_flat.reshape(orig_shape)


if __name__ == "__main__":
    key = jax.random.PRNGKey(0)

    def ref(x, bound):
        xf = x.astype(jnp.float32)
        return xf / (1.0 + jnp.abs(xf / bound))

    # Primary case: small NCHW input consistent with a conv-style module.
    x = jax.random.normal(key, (2, 4, 16, 16), dtype=jnp.float32) * 3.0
    y = jax.block_until_ready(soft_clip(x, bound=1.0))
    assert y.shape == x.shape and y.dtype == x.dtype
    assert jnp.allclose(y, ref(x, 1.0), atol=1e-6, rtol=1e-6)

    k1, k2, k3, k4 = jax.random.split(key, 4)

    # Row count that is not a sublane multiple -> single full-array block.
    x2 = jax.random.normal(k1, (105, 128), dtype=jnp.float32) * 5.0
    y2 = jax.block_until_ready(soft_clip(x2, bound=2.0))
    assert jnp.allclose(y2, ref(x2, 2.0), atol=1e-6, rtol=1e-6)

    # Awkward element count (no 128-aligned factor) -> bulk-through-kernel +
    # plain-JAX tail path (no pad/slice of the whole array).
    x3 = jax.random.normal(k2, (2, 3, 7, 40), dtype=jnp.float32)
    y3 = jax.block_until_ready(soft_clip(x3, bound=0.5))
    assert jnp.allclose(y3, ref(x3, 0.5), atol=1e-6, rtol=1e-6)

    # Large enough for several grid steps (partial last block; even split
    # across both TensorCores on v7x).
    x4 = jax.random.normal(k3, (1280, 4096), dtype=jnp.float32) * 2.0
    y4 = jax.block_until_ready(soft_clip(x4, bound=1.0))
    assert jnp.allclose(y4, ref(x4, 1.0), atol=1e-6, rtol=1e-6)

    # bf16: native bf16 VPU path on v6e/v7x, f32-widened once on older chips.
    x5 = jax.random.normal(k4, (64, 256), dtype=jnp.bfloat16)
    y5 = jax.block_until_ready(soft_clip(x5, bound=1.0))
    assert y5.dtype == jnp.bfloat16
    assert jnp.allclose(y5.astype(jnp.float32), ref(x5, 1.0), atol=2e-2, rtol=2e-2)

    print("KERNEL_OK")
</pallas_src>

<mosaic_0001>
module attributes {stable_mosaic.version = 11 : i64} {
  func.func @_softclip_kernel(%arg0: i32, %arg1: memref<1x2048xf32, #tpu.memory_space<vmem>>, %arg2: memref<1x2048xf32, #tpu.memory_space<vmem>>) attributes {dimension_semantics = [#tpu.dimension_semantics<parallel>], iteration_bounds = array<i64: 1>, scalar_prefetch = 0 : i64, scratch_operands = 0 : i64, tpu.core_type = #tpu.core_type<tc>, window_params = [{transform_indices = @transform_0, window_bounds = array<i64: 1, 2048>}, {transform_indices = @transform_1, window_bounds = array<i64: 1, 2048>}]} {
    %c0 = arith.constant 0 : index
    %c0_0 = arith.constant 0 : index
    %0 = vector.load %arg1[%c0, %c0_0] : memref<1x2048xf32, #tpu.memory_space<vmem>>, vector<1x2048xf32>
    %cst = arith.constant 1.000000e+00 : f32
    %1 = vector.broadcast %cst : f32 to vector<1x2048xf32>
    %2 = arith.mulf %0, %1 : vector<1x2048xf32>
    %3 = math.absf %2 : vector<1x2048xf32>
    %cst_1 = arith.constant 1.000000e+00 : f32
    %4 = vector.broadcast %cst_1 : f32 to vector<1x2048xf32>
    %5 = arith.addf %4, %3 : vector<1x2048xf32>
    %6 = arith.divf %0, %5 : vector<1x2048xf32>
    %c0_2 = arith.constant 0 : index
    %c0_3 = arith.constant 0 : index
    %7 = vector.load %arg2[%c0_2, %c0_3] : memref<1x2048xf32, #tpu.memory_space<vmem>>, vector<1x2048xf32>
    tpu.vector_store %arg2[%c0_2, %c0_3], %6 {strides = array<i32>} : memref<1x2048xf32, #tpu.memory_space<vmem>>, vector<1x2048xf32>,
    return
  }
  func.func @transform_0(%arg0: i32) -> (i32, i32) {
    %c0_i32 = arith.constant 0 : i32
    %c0_i32_0 = arith.constant 0 : i32
    return %arg0, %c0_i32 : i32, i32
  }
  func.func @transform_1(%arg0: i32) -> (i32, i32) {
    %c0_i32 = arith.constant 0 : i32
    %c0_i32_0 = arith.constant 0 : i32
    return %arg0, %c0_i32 : i32, i32
  }
}

</mosaic_0001>

<bundles_post_ra>
// kernel: soft_clip.1
= control target key start
LH: loop header
LB: loop body
LE: loop exit
PB: predicated region body
PF: predicated region fallthrough
CT: control target
= control target key end

     0   :  { %s76_s0 = inlined_call_operand.vmem [shape: f32[1,2048], index: 0, kind: input, shape index: {}]   ;;  %s77_s1 = inlined_call_operand.vmem [shape: f32[1,2048], index: 1, kind: output, shape index: {}]  }
   0x1   :  { %v8_v0 = vld [vmem:[%s76_s0] sm:$0xff]  ;;  %v9_v1 = vld [vmem:[%s76_s0 + $0x8] sm:$0xff] }
   0x2   :  { %v10_v2 = vand.u32 2147483647, %v8_v0  ;;  %v11_v3 = vand.u32 2147483647, %v9_v1 }
   0x4   :  { %v12_v4 = vadd.f32 1.0, %v10_v2  ;;  %v13_v5 = vadd.f32 1.0, %v11_v3 }
   0x6   :  { %50 = vrcp.f32 %v12_v4  ;;  %vm19_vm0 = vweird.f32 %v12_v4  ;;  %v25_v9 = vand.u32 2147483648, %v12_v4  ;;  %v23_v12 = vand.u32 2147483647, %v12_v4 }
   0x7   :  { %52 = vrcp.f32 %v13_v5  ;;  %v40_v13 = vand.u32 2147483648, %v13_v5  ;;  %vm34_vm2 = vweird.f32 %v13_v5  ;;  %v38_v15 = vand.u32 2147483647, %v13_v5 }
   0x8   :  { %v26_v17 = vor.u32 1.1754944e-38, %v25_v9  ;;  %vm24_vm5 = vcmp.eq.f32.partialorder %v23_v12, 8.507059e+37 }
   0x9   :  { %v41_v20 = vor.u32 1.1754944e-38, %v40_v13  ;;  %vm39_vm7 = vcmp.eq.f32.partialorder %v38_v15, 8.507059e+37 }
   0xc   :  { %v51_v6 = vpop.eup %50 }
   0xd   :  { %v53_v7 = vpop.eup %52  ;;  %v15_v8 = vmul.f32 %v51_v6, %v12_v4  ;;  %vm20_vm1 = vweird.f32 %v51_v6 }
   0xe   :  { %v30_v10 = vmul.f32 %v53_v7, %v13_v5  ;;  %vm35_vm3 = vweird.f32 %v53_v7  ;;  %vm21_vm4 = vmor %vm19_vm0, %vm20_vm1 }
   0xf   :  { %v16_v11 = vsub.f32 1.0, %v15_v8  ;;  %vm36_vm6 = vmor %vm34_vm2, %vm35_vm3 }
  0x10   :  { %v31_v14 = vsub.f32 1.0, %v30_v10 }
  0x11   :  { %v17_v16 = vmul.f32 %v51_v6, %v16_v11 }
  0x12   :  { %v32_v18 = vmul.f32 %v53_v7, %v31_v14 }
  0x13   :  { %v18_v19 = vadd.f32 %v51_v6, %v17_v16 }
  0x14   :  { %v33_v21 = vadd.f32 %v53_v7, %v32_v18 }
  0x15   :  { %v22_v22 = vsel %vm21_vm4, %v51_v6, %v18_v19 }
  0x16   :  { %v27_v23 = vsel %vm24_vm5, %v26_v17, %v22_v22  ;;  %v37_v24 = vsel %vm36_vm6, %v53_v7, %v33_v21 }
  0x17   :  { %v28_v25 = vmul.f32 %v27_v23, %v8_v0  ;;  %v42_v26 = vsel %vm39_vm7, %v41_v20, %v37_v24 }
  0x18   :  { %v43_v27 = vmul.f32 %v42_v26, %v9_v1 }
  0x19   :  { %44 = vst [vmem:[%s77_s1] sm:$0xff] %v28_v25 }
  0x1a   :  { %45 = vst [vmem:[%s77_s1 + $0x8] sm:$0xff] %v43_v27 }

</bundles_post_ra>
